<compile_context>
chip_gen: v5e
topology: v5e:2x2
jax: 0.10.0
libtpu: 0.0.40
codegen_flags: <defaults>
</compile_context>

<pallas_src>
import functools
import math

import jax
import jax.numpy as jnp
from jax.experimental import pallas as pl
from jax.experimental.pallas import tpu as pltpu


def _tpu_generation():
    try:
        kind = jax.devices()[0].device_kind.lower()
    except Exception:
        return 6
    for g in ('7', '6', '5', '4', '3'):
        if g in kind:
            return int(g)
    return 6


_TPU_GEN = _tpu_generation()
# v7x has only 64 MiB physical VMEM per TensorCore -> leave headroom; v5e/v6e have 128 MiB.
VMEM_LIMIT = (44 if _TPU_GEN >= 7 else 64) * 1024 * 1024
TM_TARGET = 512                                   # weight-streaming matmuls: higher arithmetic intensity
MLP_TM_TARGET = 256 if _TPU_GEN >= 7 else 512     # shrink MLP working set on v7x
MLP_TF_TARGET = 256 if _TPU_GEN >= 7 else 512


def _tile(dim, target, mult):
    """Largest tile <= target that divides dim and is a multiple of mult (else dim itself)."""
    if dim <= target:
        return dim
    t = (target // mult) * mult
    while t >= mult:
        if dim % t == 0:
            return t
        t -= mult
    # TODO(synk): pad awkward (prime-ish) dims up to a tile multiple instead of falling back to
    # the full dim (a full-dim block on a huge axis would blow VMEM).
    return dim


def _cparams(dims):
    return pltpu.CompilerParams(dimension_semantics=dims, vmem_limit_bytes=VMEM_LIMIT)


# ----------------------------- Pallas kernels ------------------------------


def _qkv_kernel(x_ref, nw_ref, w_ref, a_ref, b_ref, cos_ref, sin_ref, o_ref,
                hnorm_sc, ax_sc, *, eps, lora_scale, n_heads, half, sm_scale):
    # Fused RMSNorm + QKV projection + LoRA(q,v) + RoPE(q,k) + sm_scale(q).
    # Grid = (M tiles, 3H head blocks); head axis is "arbitrary" so the normalized activations
    # and the LoRA ax = norm(x) @ A_cat stay resident in VMEM scratch across all head tiles.
    j = pl.program_id(1)

    @pl.when(j == 0)
    def _():
        x = x_ref[...].astype(jnp.float32)
        var = jnp.mean(x * x, axis=-1, keepdims=True)
        hn = (x * jax.lax.rsqrt(var + eps) * nw_ref[...]).astype(hnorm_sc.dtype)
        hnorm_sc[...] = hn
        ax_sc[...] = jnp.dot(hn, a_ref[...],
                             preferred_element_type=jnp.float32).astype(ax_sc.dtype)

    hn = hnorm_sc[...]
    y = jnp.dot(hn, w_ref[...], preferred_element_type=jnp.float32)
    y = y + lora_scale * jnp.dot(ax_sc[...], b_ref[...],
                                 preferred_element_type=jnp.float32)

    # RoPE rotate-half via XLU roll; applied only to q/k head blocks (j < 2H).
    dh = y.shape[-1]
    sign = jnp.where(jax.lax.broadcasted_iota(jnp.int32, (1, dh), 1) < half, -1.0, 1.0)
    rot = pltpu.roll(y, shift=half, axis=1) * sign
    roped = y * cos_ref[...] + rot * sin_ref[...]
    m_rope = (j < 2 * n_heads).astype(jnp.float32)          # 1 for q/k blocks, 0 for v
    q_scale = 1.0 + (j < n_heads).astype(jnp.float32) * (sm_scale - 1.0)
    y = (roped * m_rope + y * (1.0 - m_rope)) * q_scale
    o_ref[...] = y.astype(o_ref.dtype)


def _flash_attn_kernel(q_ref, k_ref, v_ref, kb_ref, o_ref, m_sc, l_sc, acc_sc, *, tq, tk):
    # Online-softmax flash attention. Grid = (B, H, q-tiles, kv-tiles), kv last ("arbitrary").
    # sm_scale is already folded into q. Fully-masked (above-diagonal) kv tiles are skipped.
    qi = pl.program_id(2)
    ki = pl.program_id(3)

    @pl.when(ki == 0)
    def _():
        m_sc[...] = jnp.full_like(m_sc, -jnp.inf)
        l_sc[...] = jnp.zeros_like(l_sc)
        acc_sc[...] = jnp.zeros_like(acc_sc)

    @pl.when(ki * tk <= (qi + 1) * tq - 1)       # some (row >= col) pair exists in this tile
    def _():
        s = jax.lax.dot_general(q_ref[...], k_ref[...], (((1,), (1,)), ((), ())),
                                preferred_element_type=jnp.float32)
        s = s + kb_ref[0]                                     # (1, tk) key-padding bias
        rows = qi * tq + jax.lax.broadcasted_iota(jnp.int32, (tq, tk), 0)
        cols = ki * tk + jax.lax.broadcasted_iota(jnp.int32, (tq, tk), 1)
        s = jnp.where(rows >= cols, s, -1e9)                  # causal mask built in-kernel

        m_prev = m_sc[...]
        m_new = jnp.maximum(m_prev, jnp.max(s, axis=-1, keepdims=True))
        alpha = jnp.exp(m_prev - m_new)
        p = jnp.exp(s - m_new)
        l_sc[...] = alpha * l_sc[...] + jnp.sum(p, axis=-1, keepdims=True)
        acc_sc[...] = alpha * acc_sc[...] + jnp.dot(
            p.astype(v_ref.dtype), v_ref[...], preferred_element_type=jnp.float32)
        m_sc[...] = m_new

    @pl.when(ki == pl.num_programs(3) - 1)
    def _():
        o_ref[...] = (acc_sc[...] *
                      pl.reciprocal(l_sc[...], approx=True)).astype(o_ref.dtype)


def _out_proj_kernel(attn_ref, w_ref, resid_ref, o_ref):
    # y = resid + attn @ Wo   (residual add fused into the store epilogue).
    y = jnp.dot(attn_ref[...], w_ref[...], preferred_element_type=jnp.float32)
    o_ref[...] = (resid_ref[...].astype(jnp.float32) + y).astype(o_ref.dtype)


def _mlp_kernel(x_ref, nw_ref, wg_ref, wu_ref, wd_ref, o_ref, hnorm_sc, acc_sc, *, eps):
    # Fused RMSNorm + SwiGLU + down-projection + residual; F is the reduction grid axis.
    f = pl.program_id(1)

    @pl.when(f == 0)
    def _():
        x = x_ref[...].astype(jnp.float32)
        var = jnp.mean(x * x, axis=-1, keepdims=True)
        hnorm_sc[...] = (x * jax.lax.rsqrt(var + eps) * nw_ref[...]).astype(hnorm_sc.dtype)
        acc_sc[...] = jnp.zeros_like(acc_sc)

    hn = hnorm_sc[...]
    g = jnp.dot(hn, wg_ref[...], preferred_element_type=jnp.float32)
    u = jnp.dot(hn, wu_ref[...], preferred_element_type=jnp.float32)
    h = (g * jax.nn.sigmoid(g) * u).astype(hn.dtype)          # bf16 for the MXU
    acc_sc[...] += jnp.dot(h, wd_ref[...], preferred_element_type=jnp.float32)

    @pl.when(f == pl.num_programs(1) - 1)
    def _():
        o_ref[...] = (x_ref[...].astype(jnp.float32) + acc_sc[...]).astype(o_ref.dtype)


def _norm_linear_kernel(x_ref, nw_ref, w_ref, o_ref, hnorm_sc, *, eps):
    # Fused final RMSNorm + lm_head projection (norm hoisted across the vocab-tile axis).
    @pl.when(pl.program_id(1) == 0)
    def _():
        x = x_ref[...].astype(jnp.float32)
        var = jnp.mean(x * x, axis=-1, keepdims=True)
        hnorm_sc[...] = (x * jax.lax.rsqrt(var + eps) * nw_ref[...]).astype(hnorm_sc.dtype)

    o_ref[...] = jnp.dot(hnorm_sc[...], w_ref[...],
                         preferred_element_type=jnp.float32).astype(o_ref.dtype)


def _small_matmul_kernel(a_ref, b_ref, o_ref):
    o_ref[...] = jnp.dot(a_ref[...], b_ref[...], preferred_element_type=jnp.float32)


# ----------------------------- kernel wrappers ------------------------------


def pallas_fused_qkv(x, norm_w, w_qkv, a_cat, b_cat, cos, sin, *, seq, n_heads, head_dim,
                     eps, lora_scale, sm_scale, tm_target=TM_TARGET):
    M, D = x.shape
    N3 = w_qkv.shape[1]
    r2 = a_cat.shape[1]
    tm = _tile(seq, tm_target, 8)                  # tm | S keeps row blocks within a sequence
    nm = M // tm
    s_blocks = seq // tm
    n_blocks = N3 // head_dim
    kernel = functools.partial(_qkv_kernel, eps=eps, lora_scale=lora_scale,
                               n_heads=n_heads, half=head_dim // 2, sm_scale=sm_scale)
    return pl.pallas_call(
        kernel,
        out_shape=jax.ShapeDtypeStruct((M, N3), x.dtype),
        grid=(nm, n_blocks),
        in_specs=[pl.BlockSpec((tm, D), lambda i, j: (i, 0)),
                  pl.BlockSpec((1, D), lambda i, j: (0, 0)),
                  pl.BlockSpec((D, head_dim), lambda i, j: (0, j)),
                  pl.BlockSpec((D, r2), lambda i, j: (0, 0)),
                  pl.BlockSpec((r2, head_dim), lambda i, j: (0, j)),
                  pl.BlockSpec((tm, head_dim), lambda i, j: (i % s_blocks, 0)),
                  pl.BlockSpec((tm, head_dim), lambda i, j: (i % s_blocks, 0))],
        out_specs=pl.BlockSpec((tm, head_dim), lambda i, j: (i, j)),
        scratch_shapes=[pltpu.VMEM((tm, D), x.dtype),
                        pltpu.VMEM((tm, r2), x.dtype)],
        compiler_params=_cparams(("parallel", "arbitrary")),
    )(x, norm_w, w_qkv, a_cat, b_cat, cos, sin)


def pallas_flash_attention(qkv, kbias, *, batch, seq, n_heads, head_dim,
                           tq_target=512, tk_target=1024):
    M = qkv.shape[0]
    D = n_heads * head_dim
    tq = _tile(seq, tq_target, 8)
    tk = _tile(seq, tk_target, 128)
    nq, nk = seq // tq, seq // tk

    def q_map(b, h, qi, ki):
        return (b * nq + qi, h)

    def _k_clamp(qi, ki):
        # Skipped (above-diagonal) steps re-reference the previous kv block -> no new DMA.
        return jnp.minimum(ki, ((qi + 1) * tq - 1) // tk)

    def k_map(b, h, qi, ki):
        return (b * nk + _k_clamp(qi, ki), n_heads + h)

    def v_map(b, h, qi, ki):
        return (b * nk + _k_clamp(qi, ki), 2 * n_heads + h)

    def kb_map(b, h, qi, ki):
        return (b, 0, _k_clamp(qi, ki))

    kernel = functools.partial(_flash_attn_kernel, tq=tq, tk=tk)
    return pl.pallas_call(
        kernel,
        out_shape=jax.ShapeDtypeStruct((M, D), qkv.dtype),
        grid=(batch, n_heads, nq, nk),
        in_specs=[pl.BlockSpec((tq, head_dim), q_map),
                  pl.BlockSpec((tk, head_dim), k_map),
                  pl.BlockSpec((tk, head_dim), v_map),
                  pl.BlockSpec((1, 1, tk), kb_map)],
        out_specs=pl.BlockSpec((tq, head_dim), q_map),
        scratch_shapes=[pltpu.VMEM((tq, 1), jnp.float32),
                        pltpu.VMEM((tq, 1), jnp.float32),
                        pltpu.VMEM((tq, head_dim), jnp.float32)],
        compiler_params=_cparams(("parallel", "parallel", "parallel", "arbitrary")),
    )(qkv, qkv, qkv, kbias)


def pallas_out_proj_residual(attn, w, resid, tm_target=TM_TARGET, tn_target=512):
    M, K = attn.shape
    N = w.shape[1]
    tm = _tile(M, tm_target, 8)
    tn = _tile(N, tn_target, 128)
    return pl.pallas_call(
        _out_proj_kernel,
        out_shape=jax.ShapeDtypeStruct((M, N), resid.dtype),
        grid=(M // tm, N // tn),
        in_specs=[pl.BlockSpec((tm, K), lambda i, j: (i, 0)),
                  pl.BlockSpec((K, tn), lambda i, j: (0, j)),
                  pl.BlockSpec((tm, tn), lambda i, j: (i, j))],
        out_specs=pl.BlockSpec((tm, tn), lambda i, j: (i, j)),
        compiler_params=_cparams(("parallel", "parallel")),
    )(attn, w, resid)


def pallas_norm_mlp_residual(x, norm_w, wg, wu, wd, eps,
                             tm_target=MLP_TM_TARGET, tf_target=MLP_TF_TARGET):
    M, D = x.shape
    F = wg.shape[1]
    tm = _tile(M, tm_target, 8)
    tf = _tile(F, tf_target, 128)
    return pl.pallas_call(
        functools.partial(_mlp_kernel, eps=eps),
        out_shape=jax.ShapeDtypeStruct((M, D), x.dtype),
        grid=(M // tm, F // tf),
        in_specs=[pl.BlockSpec((tm, D), lambda i, f: (i, 0)),
                  pl.BlockSpec((1, D), lambda i, f: (0, 0)),
                  pl.BlockSpec((D, tf), lambda i, f: (0, f)),
                  pl.BlockSpec((D, tf), lambda i, f: (0, f)),
                  pl.BlockSpec((tf, D), lambda i, f: (f, 0))],
        out_specs=pl.BlockSpec((tm, D), lambda i, f: (i, 0)),
        scratch_shapes=[pltpu.VMEM((tm, D), x.dtype),
                        pltpu.VMEM((tm, D), jnp.float32)],
        compiler_params=_cparams(("parallel", "arbitrary")),
    )(x, norm_w, wg, wu, wd)


def pallas_norm_linear(x, norm_w, w, eps, out_dtype=jnp.float32,
                       tm_target=TM_TARGET, tn_target=512):
    M, D = x.shape
    N = w.shape[1]
    n_pad = (-N) % 128                              # keep the output lane-dense / tileable
    if n_pad:
        w = jnp.pad(w, ((0, 0), (0, n_pad)))
    Np = N + n_pad
    tm = _tile(M, tm_target, 8)
    tn = _tile(Np, tn_target, 128)
    out = pl.pallas_call(
        functools.partial(_norm_linear_kernel, eps=eps),
        out_shape=jax.ShapeDtypeStruct((M, Np), out_dtype),
        grid=(M // tm, Np // tn),
        in_specs=[pl.BlockSpec((tm, D), lambda i, j: (i, 0)),
                  pl.BlockSpec((1, D), lambda i, j: (0, 0)),
                  pl.BlockSpec((D, tn), lambda i, j: (0, j))],
        out_specs=pl.BlockSpec((tm, tn), lambda i, j: (i, j)),
        scratch_shapes=[pltpu.VMEM((tm, D), x.dtype)],
        compiler_params=_cparams(("parallel", "arbitrary")),
    )(x, norm_w, w)
    return out[:, :N] if n_pad else out


def pallas_small_matmul(a, b):
    M = a.shape[0]
    N = b.shape[1]
    return pl.pallas_call(
        _small_matmul_kernel,
        out_shape=jax.ShapeDtypeStruct((M, N), jnp.float32),
        compiler_params=_cparams(None),
    )(a, b)


# ----------------------------- model (glue + params) ------------------------------


def rope_tables(S, Dh, theta):
    half = Dh // 2
    inv_freq = 1.0 / (theta ** (jnp.arange(0, half, dtype=jnp.float32) / half))
    pos = jnp.arange(S, dtype=jnp.float32)
    freqs = jnp.outer(pos, inv_freq)                        # (S, half)
    emb = jnp.concatenate([freqs, freqs], axis=-1)          # (S, Dh)
    return jnp.cos(emb), jnp.sin(emb)


def init_params(key, cfg):
    D, F, V = cfg['d_model'], cfg['d_ff'], cfg['vocab']
    L, r = cfg['n_layers'], cfg['lora_rank']
    keys = jax.random.split(key, 2 + L)

    def w(k, shape, s=0.02):
        return (s * jax.random.normal(k, shape, jnp.float32)).astype(jnp.bfloat16)

    params = {
        'embed': w(keys[0], (V, D)),
        'final_norm': jnp.ones((1, D), jnp.float32),
        'lm_head': w(keys[1], (D, V)),                      # (in, out): pre-transposed
        'layers': [],
    }
    for li in range(L):
        ks = jax.random.split(keys[2 + li], 11)
        wq, wk, wv = w(ks[0], (D, D)), w(ks[1], (D, D)), w(ks[2], (D, D))
        # LoRA adapters on q_proj / v_proj, stored (in, out); B nonzero so the branch is exercised.
        aq, bq = w(ks[7], (D, r)), w(ks[8], (r, D))
        av, bv = w(ks[9], (D, r)), w(ks[10], (r, D))
        w_qkv = jnp.concatenate([wq, wk, wv], axis=1)       # (D, 3D)
        a_cat = jnp.concatenate([aq, av], axis=1)           # (D, 2r)
        b_cat = jnp.zeros((2 * r, 3 * D), jnp.bfloat16)     # (2r, 3D): q cols <- Bq, v cols <- Bv
        b_cat = b_cat.at[:r, :D].set(bq)
        b_cat = b_cat.at[r:, 2 * D:].set(bv)
        params['layers'].append({
            'input_norm': jnp.ones((1, D), jnp.float32),
            'post_norm': jnp.ones((1, D), jnp.float32),
            'w_qkv': w_qkv, 'a_cat': a_cat, 'b_cat': b_cat,
            'wo': w(ks[3], (D, D)),
            'w_gate': w(ks[4], (D, F)), 'w_up': w(ks[5], (D, F)),
            'w_down': w(ks[6], (F, D)),
            'lora': {'q': (aq, bq), 'v': (av, bv)},
        })
    return params


def lora_l2_loss(params):
    # Mirrors torch: sum((lora_A @ lora_B)**2) per adapted module; with our (in,out) storage
    # that product equals (B_s @ A_s)^T and the squared-sum is transpose-invariant.
    loss = jnp.float32(0.0)
    for layer in params['layers']:
        for a_s, b_s in layer['lora'].values():
            prod = pallas_small_matmul(b_s, a_s)            # (r, D) @ (D, r) -> (r, r)
            loss = loss + jnp.sum(prod ** 2)
    return loss


def llama2_generative_forward(params, input_ids, attention_mask, cfg):
    B, S = input_ids.shape
    D, H = cfg['d_model'], cfg['n_heads']
    Dh = D // H
    assert S % 8 == 0 and Dh % 128 == 0
    lora_scale = cfg['lora_alpha'] / cfg['lora_rank']
    sm_scale = 1.0 / math.sqrt(Dh)

    # Embedding gather (XLA glue; no dense-compute Pallas win).
    x = jnp.take(params['embed'], input_ids, axis=0).reshape(B * S, D)

    # Tiny additive key-padding bias (B, 1, S); causal mask is generated in-kernel.
    kbias = ((1.0 - attention_mask.astype(jnp.float32)) * -1e9).reshape(B, 1, S)

    # RoPE tables, (S, Dh) — addressed modularly by the QKV index map (no B-fold tiling).
    cos, sin = rope_tables(S, Dh, cfg['rope_theta'])

    for layer in params['layers']:
        qkv = pallas_fused_qkv(x, layer['input_norm'], layer['w_qkv'],
                               layer['a_cat'], layer['b_cat'], cos, sin,
                               seq=S, n_heads=H, head_dim=Dh, eps=cfg['rms_eps'],
                               lora_scale=lora_scale, sm_scale=sm_scale)
        attn = pallas_flash_attention(qkv, kbias, batch=B, seq=S, n_heads=H, head_dim=Dh)
        x = pallas_out_proj_residual(attn, layer['wo'], x)
        x = pallas_norm_mlp_residual(x, layer['post_norm'], layer['w_gate'],
                                     layer['w_up'], layer['w_down'], cfg['rms_eps'])

    logits = pallas_norm_linear(x, params['final_norm'], params['lm_head'],
                                cfg['rms_eps'], out_dtype=jnp.float32)
    logits = logits.reshape(B, S, cfg['vocab'])

    outputs = dict(logits=logits)
    outputs['lora_l2_loss'] = 0
    if cfg['lora_l2'] > 0:
        outputs['lora_l2_loss'] = cfg['lora_l2'] * lora_l2_loss(params)
    return outputs


# ----------------------------- main ------------------------------


if __name__ == "__main__":
    cfg = dict(
        vocab=256, d_model=256, n_heads=2, n_layers=2, d_ff=512,
        lora_rank=16, lora_alpha=16.0, lora_dropout=0.0, lora_l2=0.0,
        rms_eps=1e-5, rope_theta=10000.0,
    )
    key = jax.random.PRNGKey(0)
    pkey, ikey = jax.random.split(key)
    params = init_params(pkey, cfg)

    B, S = 2, 8
    input_ids = jax.random.randint(ikey, (B, S), 0, cfg['vocab'], dtype=jnp.int32)
    attention_mask = jnp.array([[1] * S, [1] * (S - 2) + [0] * 2], dtype=jnp.int32)
    batch = {'input_ids': input_ids, 'attention_mask': attention_mask}

    outputs = llama2_generative_forward(
        params, batch['input_ids'], batch['attention_mask'], cfg)
    logits = jax.block_until_ready(outputs['logits'])
    assert logits.shape == (B, S, cfg['vocab'])
    assert bool(jnp.all(jnp.isfinite(logits)))

    # Exercise the LoRA L2 path as well (cfg default keeps it disabled, as in torch).
    _ = jax.block_until_ready(lora_l2_loss(params))
    print("KERNEL_OK")
</pallas_src>

<mosaic_0001>
module attributes {stable_mosaic.version = 11 : i64} {
  func.func @_qkv_kernel(%arg0: i32, %arg1: i32, %arg2: memref<8x256xbf16, #tpu.memory_space<vmem>>, %arg3: memref<1x256xf32, #tpu.memory_space<vmem>>, %arg4: memref<256x128xbf16, #tpu.memory_space<vmem>>, %arg5: memref<256x32xbf16, #tpu.memory_space<vmem>>, %arg6: memref<32x128xbf16, #tpu.memory_space<vmem>>, %arg7: memref<8x128xf32, #tpu.memory_space<vmem>>, %arg8: memref<8x128xf32, #tpu.memory_space<vmem>>, %arg9: memref<8x128xbf16, #tpu.memory_space<vmem>>, %arg10: memref<8x256xbf16, #tpu.memory_space<vmem>>, %arg11: memref<8x32xbf16, #tpu.memory_space<vmem>>) attributes {dimension_semantics = [#tpu.dimension_semantics<parallel>, #tpu.dimension_semantics<arbitrary>], iteration_bounds = array<i64: 2, 6>, scalar_prefetch = 0 : i64, scratch_operands = 2 : i64, tpu.core_type = #tpu.core_type<tc>, window_params = [{transform_indices = @transform_0, window_bounds = array<i64: 8, 256>}, {pipeline_mode = #tpu.pipeline_mode<synchronous>, transform_indices = @transform_1, window_bounds = array<i64: 1, 256>}, {transform_indices = @transform_2, window_bounds = array<i64: 256, 128>}, {pipeline_mode = #tpu.pipeline_mode<synchronous>, transform_indices = @transform_3, window_bounds = array<i64: 256, 32>}, {transform_indices = @transform_4, window_bounds = array<i64: 32, 128>}, {transform_indices = @transform_5, window_bounds = array<i64: 8, 128>}, {transform_indices = @transform_6, window_bounds = array<i64: 8, 128>}, {transform_indices = @transform_7, window_bounds = array<i64: 8, 128>}]} {
    %c0_i32 = arith.constant 0 : i32
    %0 = arith.cmpi eq, %arg1, %c0_i32 : i32
    %1 = arith.extui %0 : i1 to i32
    %c0_i32_0 = arith.constant 0 : i32
    %2 = arith.cmpi ne, %1, %c0_i32_0 : i32
    scf.if %2 {
      %c0_22 = arith.constant 0 : index
      %c0_23 = arith.constant 0 : index
      %44 = vector.load %arg2[%c0_22, %c0_23] : memref<8x256xbf16, #tpu.memory_space<vmem>>, vector<8x256xbf16>
      %45 = arith.extf %44 : vector<8x256xbf16> to vector<8x256xf32>
      %46 = arith.mulf %45, %45 : vector<8x256xf32>
      %cst_24 = arith.constant dense<0.000000e+00> : vector<8xf32>
      %47 = vector.multi_reduction <add>, %46, %cst_24 [1] : vector<8x256xf32> to vector<8xf32>
      %48 = vector.shape_cast %47 : vector<8xf32> to vector<8x1xf32>
      %cst_25 = arith.constant 2.560000e+02 : f32
      %49 = vector.broadcast %cst_25 : f32 to vector<8x1xf32>
      %50 = arith.divf %48, %49 : vector<8x1xf32>
      %cst_26 = arith.constant 9.99999974E-6 : f32
      %51 = vector.broadcast %cst_26 : f32 to vector<8x1xf32>
      %52 = arith.addf %50, %51 : vector<8x1xf32>
      %53 = math.rsqrt %52 : vector<8x1xf32>
      %54 = vector.broadcast %53 : vector<8x1xf32> to vector<8x256xf32>
      %55 = arith.mulf %45, %54 : vector<8x256xf32>
      %c0_27 = arith.constant 0 : index
      %c0_28 = arith.constant 0 : index
      %56 = vector.load %arg3[%c0_27, %c0_28] : memref<1x256xf32, #tpu.memory_space<vmem>>, vector<1x256xf32>
      %57 = vector.broadcast %56 : vector<1x256xf32> to vector<8x256xf32>
      %58 = arith.mulf %55, %57 : vector<8x256xf32>
      %59 = arith.truncf %58 : vector<8x256xf32> to vector<8x256xbf16>
      %c0_29 = arith.constant 0 : index
      %c0_30 = arith.constant 0 : index
      %60 = vector.load %arg10[%c0_29, %c0_30] : memref<8x256xbf16, #tpu.memory_space<vmem>>, vector<8x256xbf16>
      tpu.vector_store %arg10[%c0_29, %c0_30], %59 {strides = array<i32>} : memref<8x256xbf16, #tpu.memory_space<vmem>>, vector<8x256xbf16>,
      %c0_31 = arith.constant 0 : index
      %c0_32 = arith.constant 0 : index
      %61 = vector.load %arg5[%c0_31, %c0_32] : memref<256x32xbf16, #tpu.memory_space<vmem>>, vector<256x32xbf16>
      %cst_33 = arith.constant dense<0.000000e+00> : vector<8x32xf32>
      %62 = tpu.matmul %59, %61, %cst_33 {dimension_numbers = #tpu.dot_dimension_numbers<[1], [0], [0], [1], [0, 0, 1, 1], [], []>} : vector<8x256xbf16>, vector<256x32xbf16>, vector<8x32xf32> -> vector<8x32xf32>
      %63 = arith.truncf %62 : vector<8x32xf32> to vector<8x32xbf16>
      %c0_34 = arith.constant 0 : index
      %c0_35 = arith.constant 0 : index
      %64 = vector.load %arg11[%c0_34, %c0_35] : memref<8x32xbf16, #tpu.memory_space<vmem>>, vector<8x32xbf16>
      tpu.vector_store %arg11[%c0_34, %c0_35], %63 {strides = array<i32>} : memref<8x32xbf16, #tpu.memory_space<vmem>>, vector<8x32xbf16>,
    } else {
    }
    %c0 = arith.constant 0 : index
    %c0_1 = arith.constant 0 : index
    %3 = vector.load %arg10[%c0, %c0_1] : memref<8x256xbf16, #tpu.memory_space<vmem>>, vector<8x256xbf16>
    %c0_2 = arith.constant 0 : index
    %c0_3 = arith.constant 0 : index
    %4 = vector.load %arg4[%c0_2, %c0_3] : memref<256x128xbf16, #tpu.memory_space<vmem>>, vector<256x128xbf16>
    %cst = arith.constant dense<0.000000e+00> : vector<8x128xf32>
    %5 = tpu.matmul %3, %4, %cst {dimension_numbers = #tpu.dot_dimension_numbers<[1], [0], [0], [1], [0, 0, 1, 1], [], []>} : vector<8x256xbf16>, vector<256x128xbf16>, vector<8x128xf32> -> vector<8x128xf32>
    %c0_4 = arith.constant 0 : index
    %c0_5 = arith.constant 0 : index
    %6 = vector.load %arg11[%c0_4, %c0_5] : memref<8x32xbf16, #tpu.memory_space<vmem>>, vector<8x32xbf16>
    %c0_6 = arith.constant 0 : index
    %c0_7 = arith.constant 0 : index
    %7 = vector.load %arg6[%c0_6, %c0_7] : memref<32x128xbf16, #tpu.memory_space<vmem>>, vector<32x128xbf16>
    %cst_8 = arith.constant dense<0.000000e+00> : vector<8x128xf32>
    %8 = tpu.matmul %6, %7, %cst_8 {dimension_numbers = #tpu.dot_dimension_numbers<[1], [0], [0], [1], [0, 0, 1, 1], [], []>} : vector<8x32xbf16>, vector<32x128xbf16>, vector<8x128xf32> -> vector<8x128xf32>
    %cst_9 = arith.constant 1.000000e+00 : f32
    %9 = vector.broadcast %cst_9 : f32 to vector<8x128xf32>
    %10 = arith.mulf %9, %8 : vector<8x128xf32>
    %11 = arith.addf %5, %10 : vector<8x128xf32>
    %12 = tpu.iota {dimensions = array<i32: 1>} : vector<1x128xi32>
    %c64_i32 = arith.constant 64 : i32
    %13 = vector.broadcast %c64_i32 : i32 to vector<1x128xi32>
    %14 = arith.cmpi slt, %12, %13 : vector<1x128xi32>
    %cst_10 = arith.constant -1.000000e+00 : f32
    %cst_11 = arith.constant 1.000000e+00 : f32
    %15 = vector.broadcast %cst_10 : f32 to vector<1x128xf32>
    %16 = vector.broadcast %cst_11 : f32 to vector<1x128xf32>
    %17 = arith.select %14, %15, %16 : vector<1x128xi1>, vector<1x128xf32>
    %c64_i32_12 = arith.constant 64 : i32
    %18 = tpu.dynamic_rotate %11 by %c64_i32_12 dim 1 : vector<8x128xf32>, i32 -> vector<8x128xf32>
    %19 = vector.broadcast %17 : vector<1x128xf32> to vector<8x128xf32>
    %20 = arith.mulf %18, %19 : vector<8x128xf32>
    %c0_13 = arith.constant 0 : index
    %c0_14 = arith.constant 0 : index
    %21 = vector.load %arg7[%c0_13, %c0_14] : memref<8x128xf32, #tpu.memory_space<vmem>>, vector<8x128xf32>
    %22 = arith.mulf %11, %21 : vector<8x128xf32>
    %c0_15 = arith.constant 0 : index
    %c0_16 = arith.constant 0 : index
    %23 = vector.load %arg8[%c0_15, %c0_16] : memref<8x128xf32, #tpu.memory_space<vmem>>, vector<8x128xf32>
    %24 = arith.mulf %20, %23 : vector<8x128xf32>
    %25 = arith.addf %22, %24 : vector<8x128xf32>
    %c4_i32 = arith.constant 4 : i32
    %26 = arith.cmpi slt, %arg1, %c4_i32 : i32
    %27 = arith.extui %26 : i1 to i32
    %28 = arith.sitofp %27 : i32 to f32
    %c2_i32 = arith.constant 2 : i32
    %29 = arith.cmpi slt, %arg1, %c2_i32 : i32
    %30 = arith.extui %29 : i1 to i32
    %31 = arith.sitofp %30 : i32 to f32
    %cst_17 = arith.constant -0.911611676 : f32
    %32 = arith.mulf %31, %cst_17 : f32
    %cst_18 = arith.constant 1.000000e+00 : f32
    %33 = arith.addf %cst_18, %32 : f32
    %34 = vector.broadcast %28 : f32 to vector<8x128xf32>
    %35 = arith.mulf %25, %34 : vector<8x128xf32>
    %cst_19 = arith.constant 1.000000e+00 : f32
    %36 = arith.subf %cst_19, %28 : f32
    %37 = vector.broadcast %36 : f32 to vector<8x128xf32>
    %38 = arith.mulf %11, %37 : vector<8x128xf32>
    %39 = arith.addf %35, %38 : vector<8x128xf32>
    %40 = vector.broadcast %33 : f32 to vector<8x128xf32>
    %41 = arith.mulf %39, %40 : vector<8x128xf32>
    %42 = arith.truncf %41 : vector<8x128xf32> to vector<8x128xbf16>
    %c0_20 = arith.constant 0 : index
    %c0_21 = arith.constant 0 : index
    %43 = vector.load %arg9[%c0_20, %c0_21] : memref<8x128xbf16, #tpu.memory_space<vmem>>, vector<8x128xbf16>
    tpu.vector_store %arg9[%c0_20, %c0_21], %42 {strides = array<i32>} : memref<8x128xbf16, #tpu.memory_space<vmem>>, vector<8x128xbf16>,
    return
  }
  func.func @transform_0(%arg0: i32, %arg1: i32) -> (i32, i32) {
    %c0_i32 = arith.constant 0 : i32
    %c0_i32_0 = arith.constant 0 : i32
    return %arg0, %c0_i32 : i32, i32
  }
  func.func @transform_1(%arg0: i32, %arg1: i32) -> (i32, i32) {
    %c0_i32 = arith.constant 0 : i32
    %c0_i32_0 = arith.constant 0 : i32
    %c0_i32_1 = arith.constant 0 : i32
    return %c0_i32, %c0_i32_0 : i32, i32
  }
  func.func @transform_2(%arg0: i32, %arg1: i32) -> (i32, i32) {
    %c0_i32 = arith.constant 0 : i32
    %c0_i32_0 = arith.constant 0 : i32
    return %c0_i32, %arg1 : i32, i32
  }
  func.func @transform_3(%arg0: i32, %arg1: i32) -> (i32, i32) {
    %c0_i32 = arith.constant 0 : i32
    %c0_i32_0 = arith.constant 0 : i32
    %c0_i32_1 = arith.constant 0 : i32
    return %c0_i32, %c0_i32_0 : i32, i32
  }
  func.func @transform_4(%arg0: i32, %arg1: i32) -> (i32, i32) {
    %c0_i32 = arith.constant 0 : i32
    %c0_i32_0 = arith.constant 0 : i32
    return %c0_i32, %arg1 : i32, i32
  }
  func.func @transform_5(%arg0: i32, %arg1: i32) -> (i32, i32) {
    %c1_i32 = arith.constant 1 : i32
    %c0_i32 = arith.constant 0 : i32
    %0 = arith.cmpi eq, %c1_i32, %c0_i32 : i32
    %c1_i32_0 = arith.constant 1 : i32
    %1 = arith.select %0, %c1_i32_0, %c1_i32 : i32
    %2 = arith.remsi %arg0, %1 : i32
    %c0_i32_1 = arith.constant 0 : i32
    %3 = arith.cmpi ne, %2, %c0_i32_1 : i32
    %c0_i32_2 = arith.constant 0 : i32
    %4 = arith.cmpi slt, %2, %c0_i32_2 : i32
    %c0_i32_3 = arith.constant 0 : i32
    %5 = arith.cmpi slt, %1, %c0_i32_3 : i32
    %6 = arith.xori %4, %5 : i1
    %7 = arith.andi %6, %3 : i1
    %8 = arith.addi %2, %1 : i32
    %9 = arith.select %7, %8, %2 : i32
    %c0_i32_4 = arith.constant 0 : i32
    %c0_i32_5 = arith.constant 0 : i32
    return %9, %c0_i32_4 : i32, i32
  }
  func.func @transform_6(%arg0: i32, %arg1: i32) -> (i32, i32) {
    %c1_i32 = arith.constant 1 : i32
    %c0_i32 = arith.constant 0 : i32
    %0 = arith.cmpi eq, %c1_i32, %c0_i32 : i32
    %c1_i32_0 = arith.constant 1 : i32
    %1 = arith.select %0, %c1_i32_0, %c1_i32 : i32
    %2 = arith.remsi %arg0, %1 : i32
    %c0_i32_1 = arith.constant 0 : i32
    %3 = arith.cmpi ne, %2, %c0_i32_1 : i32
    %c0_i32_2 = arith.constant 0 : i32
    %4 = arith.cmpi slt, %2, %c0_i32_2 : i32
    %c0_i32_3 = arith.constant 0 : i32
    %5 = arith.cmpi slt, %1, %c0_i32_3 : i32
    %6 = arith.xori %4, %5 : i1
    %7 = arith.andi %6, %3 : i1
    %8 = arith.addi %2, %1 : i32
    %9 = arith.select %7, %8, %2 : i32
    %c0_i32_4 = arith.constant 0 : i32
    %c0_i32_5 = arith.constant 0 : i32
    return %9, %c0_i32_4 : i32, i32
  }
  func.func @transform_7(%arg0: i32, %arg1: i32) -> (i32, i32) {
    %c0_i32 = arith.constant 0 : i32
    return %arg0, %arg1 : i32, i32
  }
}

</mosaic_0001>

<bundles_post_ra>
// kernel: tpu_custom_call.1
= control target key start
LH: loop header
LB: loop body
LE: loop exit
PB: predicated region body
PF: predicated region fallthrough
CT: control target
= control target key end

     0   :  { %12 = vsyncpa [#allocation5], 0  ;;  %s1748_s0 = inlined_call_operand.vmem [shape: bf16[16,256], index: 0, kind: input, shape index: {}]   ;;  %s1749_s1 = inlined_call_operand.vmem [shape: f32[1,256], index: 1, kind: input, shape index: {}]   ;;  %s1750_s2 = inlined_call_operand.hbm [shape: bf16[256,768], index: 2, kind: input, shape index: {}]   ;;  %s1751_s3 = inlined_call_operand.vmem [shape: bf16[256,32], index: 3, kind: input, shape index: {}]   ;;  %s1752_s4 = inlined_call_operand.vmem [shape: bf16[32,768], index: 4, kind: input, shape index: {}]   ;;  %s1753_s5 = inlined_call_operand.vmem [shape: f32[8,128], index: 5, kind: input, shape index: {}]   ;;  %s1754_s6 = inlined_call_operand.vmem [shape: f32[8,128], index: 6, kind: input, shape index: {}]   ;;  %s1755_s7 = inlined_call_operand.hbm [shape: bf16[16,768], index: 7, kind: output, shape index: {}]  }
   0x1   :  { %14 = vsyncpa [#allocation5 + $0x1], 0 }
   0x2   :  { %15 = vsyncpa [#allocation6], 0 }
   0x3   :  { %17 = vsyncpa [#allocation6 + $0x1], 0  ;;  %s1469_s24 = smov 0   ;;  %s1471_s25 = smov 0  }
   0x4   :  { %s1473_s26 = smov 0   ;;  %s1475_s27 = smov 0  }
   0x5   :  { %s1477_s28 = smov 0   ;;  %s1479_s29 = smov 0  }
   0x6   :  { %s1481_s30 = smov 0   ;;  %s1483_s8 = smov 0  }
   0x7   :  { %s1485_s9 = smov 0   ;;  %s1487_s10 = smov 0  }
   0x8   :  { %s1489_s11 = smov 0  }
   0x9 LB: > { %1766 = sst [smem:[#allocation11_spill]] %s1381_s24  ;;  %s972_s12 = sadd.s32 4294967295, %s1421_s11   ;;  %s1421_s11 = sphi %s1489_s11, %s23_s11   ;;  %s1417_s10 = sphi %s1487_s10, %s1798_s10   ;;  %s1413_s9 = sphi %s1485_s9, %s1790_s9   ;;  %s1409_s8 = sphi %s1483_s8, %s1797_s8   ;;  %s1405_s30 = sphi %s1481_s30, %s1788_s30   ;;  %s1401_s29 = sphi %s1479_s29, %s1796_s29   ;;  %s1397_s28 = sphi %s1477_s28, %s1795_s28   ;;  %s1393_s27 = sphi %s1475_s27, %s1794_s27   ;;  %s1389_s26 = sphi %s1473_s26, %s1785_s26   ;;  %s1385_s25 = sphi %s1471_s25, %s1793_s25   ;;  %s1381_s24 = sphi %s1469_s24, %s1792_s24  }
   0xa   : > { %1767 = sst [smem:[#allocation12_spill]] %s1389_s26  ;;  %s973_s13 = sadd.s32 4294967294, %s1421_s11  }
   0xb   : > { %1768 = sst [smem:[#allocation13_spill]] %s1401_s29  ;;  %s32_s14 = sadd.s32 1, %s1413_s9 }
   0xc   : > { %1769 = sst [smem:[#allocation14_spill]] %s1413_s9  ;;  %s35_s15 = sadd.s32 1, %s1417_s10 }
   0xd   : > { %1770 = sst [smem:[#allocation15_spill]] %s1417_s10  ;;  %p33_p0 = scmp.ge.s32.totalorder %s32_s14, 6 }
   0xe   : > { %s89_s16 = sadd.s32 1, %s1401_s29  ;;  %p96_p1 = scmp.ne.s32.totalorder %s1401_s29, %s1397_s28 }
   0xf   : > { %p97_p2 = scmp.eq.s32.totalorder %s1421_s11, 0  ;;  %s1800_s14 = smov (%p33_p0, %s32_s14), 0 }
  0x10   : > { %1771 = sst [smem:[#allocation16_spill]] %s1800_s14  ;;  %s1802_s15 = smov (!%p33_p0, %s35_s15), %s1417_s10 }
  0x11   : > { %s86_s17 = ssub.s32 %s1413_s9, %s1800_s14  ;;  %p1535_p3 = por %p97_p2, %p96_p1 }
  0x12   : > { %p37_p4 = scmp.ge.s32.totalorder %s1802_s15, 2  ;;  %p87_p5 = scmp.eq.s32.totalorder %s86_s17, 0 }
  0x13   : > { %p102_p6 = scmp.ne.s32.totalorder %s1397_s28, %s1393_s27  ;;  %p103_p7 = scmp.eq.s32.totalorder %s972_s12, 0 }
  0x14   : > { %s1804_s15 = smov (%p37_p4, %s1802_s15), 0  ;;  %s206_s23 = sadd.s32 1, %s1389_s26 }
  0x15   : > { %1773 = sst [smem:[#allocation17_spill]] %s1804_s15  ;;  %p1545_p8 = por %p103_p7, %p102_p6 }
  0x16   : > { %s1543_s19 = scalar_select %p87_p5, %s1401_s29, %s89_s16  }
  0x17   : > { %s201_s21 = ssub.s32 %s1417_s10, %s1804_s15  ;;  %p216_p10 = scmp.ne.s32.totalorder %s1389_s26, %s1385_s25 }
  0x18   : > { %1774 = sst [smem:[#allocation18_spill]] %s1543_s19  ;;  %s203_s22 = sor.u32 %s201_s21, %s86_s17 }
  0x19   : > { %p204_p9 = scmp.eq.s32.totalorder %s203_s22, 0  ;;  %p217_p11 = scmp.eq.s32.totalorder %s972_s12, 11 }
  0x1a   : > { %p222_p12 = scmp.ne.s32.totalorder %s1385_s25, %s1381_s24  ;;  %p223_p0 = scmp.eq.s32.totalorder %s973_s13, 11 }
  0x1b   : > { %s1557_s14 = scalar_select %p204_p9, %s1389_s26, %s206_s23  }
  0x1c   : > { %p1559_p13 = por %p217_p11, %p216_p10  ;;  %p1563_p1 = por %p223_p0, %p222_p12 }
  0x1d   : > { %1776 = sst [smem:[#allocation19_spill]] %s1557_s14  ;;  %p975_p2 = scmp.ge.s32.totalorder %s1421_s11, 12 }
  0x1e   : > { %s1777_s27 = scalar_select %p1559_p13, 1, 0 }
  0x1f   : > { %s1779_s16 = scalar_select %p1563_p1, 1, 0 }
  0x20   : > { %1778 = sst [smem:[#allocation20_spill]] %s1777_s27  ;;  %251 = sbr.rel (%p975_p2) target bundleno = 47 (0x2f), region = 32 }
  0x21   : > { %1780 = sst [smem:[#allocation21_spill]] %s1779_s16  ;;  %s263_s17 = sand.u32 (!%p975_p2), 1, %s1401_s29  }
  0x22   : > { %s977_s12 = sshll.u32 (!%p975_p2), %s1413_s9, 2  ;;  %s976_s21 = sshll.u32 (!%p975_p2), %s263_s17, 7 }
  0x23   : > { %s271_s15 = scalar_lea.hbm (!%p975_p2), %s1750_s2, %s977_s12  ;;  %s267_s19 = scalar_lea.vmem (!%p975_p2), [#allocation4], %s976_s21 }
  0x24   : > { %s272_s10 = sshll.u32 (!%p975_p2), %s271_s15, 4  ;;  %s274_s13 = sshll.u32 (!%p975_p2), %s267_s19, 4  ;;  %s273_s10 = int_to_ptr.hbm [resolvable:$true] %s272_s10  ;;  %s275_s13 = int_to_ptr.vmem [resolvable:$true] %s274_s13 }
  0x25   : > { %s264_s14 = scalar_lea.sflag [#allocation5], %s263_s17  ;;  %s1423_s26 = smov 384  }
  0x26   : > { %s1424_s16 = smov 64   ;;  %s1425_s24 = smov 4  }
  0x27   : > { %1164 = dma.hbm_to_vmem [thread:$0]  (%p1535_p3), %s273_s10, 2048, %s275_s13, %s264_s14, %s1423_s26, %s1424_s16, %s1425_s24  }
  0x28   : > { %283 = sbr.rel (!%p1535_p3) target bundleno = 47 (0x2f), region = 44  ;;  %s978_s9 = sshll.u32 (%p1535_p3), %s263_s17, 4 }
  0x29   : > { %s289_s22 = scalar_lea.vmem (%p1535_p3), %s1752_s4, %s977_s12  ;;  %s287_s15 = scalar_lea.vmem (%p1535_p3), [#allocation7], %s978_s9 }
  0x2a   : > { %v306_v0 = vld [vmem:[%s289_s22] sm:$0xf] (%p1535_p3)  ;;  %v308_v1 = vld [vmem:[%s289_s22 + $0x18] sm:$0xf] (%p1535_p3)  ;;  %v310_v2 = vld [vmem:[%s289_s22 + $0x30] sm:$0xf] (%p1535_p3) }
  0x2b   : > { %307 = vst [vmem:[%s287_s15] sm:$0xf] (%p1535_p3), %v306_v0  ;;  %v312_v3 = vld [vmem:[%s289_s22 + $0x48] sm:$0xf] (%p1535_p3) }
  0x2c   : > { %309 = vst [vmem:[%s287_s15 + $0x4] sm:$0xf] (%p1535_p3), %v308_v1 }
  0x2d   : > { %311 = vst [vmem:[%s287_s15 + $0x8] sm:$0xf] %v310_v2 }
  0x2e   : > { %313 = vst [vmem:[%s287_s15 + $0xc] sm:$0xf] %v312_v3 }
  0x2f PF: > { %p980_p4 = scmp.ge.s32.totalorder %s1421_s11, 1  ;;  %p344_p3 = scmp.lt.s32.totalorder %s1421_s11, 13 }
  0x31   : > { %p345_p5 = pnand %p980_p4, %p344_p3 }
  0x32   : > { %s350_s24 = sand.u32 (!%p345_p5), 1, %s1397_s28  }
  0x33   : > { %348 = sbr.rel (%p345_p5) target bundleno = 656 (0x290), region = 85  ;;  %s981_s26 = sshll.u32 (!%p345_p5), %s350_s24, 7 }
  0x34   : > { %s351_s29 = scalar_lea.sflag (!%p345_p5), [#allocation5], %s350_s24  ;;  %s1583_s9 = scalar_lea.vmem (!%p345_p5), [#allocation4], %s981_s26 }
  0x38   : > { %1372 = dma.done.wait (%p1545_p8), %s351_s29, 2048  }
  0x39   : > { %1374 = vsyncadd (%p1545_p8), %s351_s29, 4294965248  ;;  %s982_s10 = sshll.u32 %s350_s24, 4  ;;  %s399_s14 = sand.u32 1, %s1385_s25  }
  0x3a   : > { %s1592_s18 = sshll.u32 %s399_s14, 2  ;;  %p402_p6 = scmp.lt.s32.totalorder %s1409_s8, 1 }
  0x3b   : > { %s1599_s21 = scalar_lea.vmem [#allocation7], %s982_s10  ;;  %s401_s20 = scalar_lea.vmem [#allocation8], %s1592_s18 }
  0x3c   : > { %s403_s19 = scalar_select %p402_p6, %s1409_s8, 1 }
  0x3d   : > { %p986_p7 = scmp.ne.s32.totalorder %s1405_s30, 0 }
  0x3e   : > { %s1128_s27 = sshll.u32 %s403_s19, 3 }
  0x3f   : > { %s406_s12 = scalar_lea.vmem %s1748_s0, %s1128_s27  ;;  %411 = sbr.rel (%p986_p7) target bundleno = 357 (0x165), region = 97 }
  0x44   : > { %v412_v4 = vld [vmem:[%s406_s12] sm:$0xff]  ;;  %v1136_v10 = vld [vmem:[%s1751_s3 + $0x38] sm:$0xff]  ;;  %v1135_v12 = vld [vmem:[%s1751_s3 + $0x30] sm:$0xff]  ;;  %v1426_v14 = vmov 256.0   ;;  %vm613_vm4 = vcmask 257024  }
  0x45   : > { %v1603_v5 = vunpack.c.l.bf16 %v412_v4  ;;  %v1605_v6 = vunpack.c.h.bf16 %v412_v4  ;;  %v1144_v11 = vld [vmem:[%s1751_s3 + $0x78] sm:$0xff]  ;;  %586 = vmatpush.bf16.msra.mxu0 %v1136_v10  ;;  %v1143_v13 = vld [vmem:[%s1751_s3 + $0x70] sm:$0xff]  ;;  %1267 = vrcp.f32 %v1426_v14  ;;  %v1134_v15 = vld [vmem:[%s1751_s3 + $0x28] sm:$0xff] }
  0x46   : > { %599 = vmatpush.bf16.msra.mxu1 %v1144_v11  ;;  %v1142_v16 = vld [vmem:[%s1751_s3 + $0x68] sm:$0xff]  ;;  %v1133_v18 = vld [vmem:[%s1751_s3 + $0x20] sm:$0xff]  ;;  %v1132_v21 = vld [vmem:[%s1751_s3 + $0x18] sm:$0xff] }
  0x47   : > { %v415_v7 = vmul.f32 %v1603_v5, %v1603_v5  ;;  %v416_v8 = vmul.f32 %v1605_v6, %v1605_v6  ;;  %v1141_v19 = vld [vmem:[%s1751_s3 + $0x60] sm:$0xff]  ;;  %v1140_v22 = vld [vmem:[%s1751_s3 + $0x58] sm:$0xff]  ;;  %v1131_v24 = vld [vmem:[%s1751_s3 + $0x10] sm:$0xff] }
  0x48   : > { %v1139_v25 = vld [vmem:[%s1751_s3 + $0x50] sm:$0xff]  ;;  %v1130_v27 = vld [vmem:[%s1751_s3 + $0x8] sm:$0xff]  ;;  %v1129_v30 = vld [vmem:[%s1751_s3] sm:$0xff] }
  0x49   : > { %v417_v9 = vadd.f32 %v416_v8, %v415_v7  ;;  %587 = vmatpush.bf16.msra.mxu0 %v1135_v12  ;;  %v1138_v28 = vld [vmem:[%s1751_s3 + $0x48] sm:$0xff]  ;;  %v1137_v31 = vld [vmem:[%s1751_s3 + $0x40] sm:$0xff] }
  0x4a   : > { %600 = vmatpush.bf16.msra.mxu1 %v1143_v13  ;;  %v441_v41 = vld [vmem:[%s1749_s1] sm:$0x3] }
  0x4b   : > { %418 = vadd.xlane.f32.xlu0 %v417_v9  ;;  %v1268_v17 = vpop.eup %1267  ;;  %v443_v43 = vperm.slane %v441_v41, 0  ;;  %v444_v44 = vperm.slane %v441_v41, 1 }
  0x4c   : > { %v421_v20 = vmul.f32 256.0, %v1268_v17  ;;  %vm425_vm0 = vweird.f32 %v1268_v17 }
  0x4d   : > { %588 = vmatpush.bf16.msra.mxu0 %v1134_v15 }
  0x4e   : > { %601 = vmatpush.bf16.msra.mxu1 %v1142_v16  ;;  %v422_v23 = vsub.f32 1.0, %v421_v20 }
  0x50   : > { %v423_v26 = vmul.f32 %v1268_v17, %v422_v23 }
  0x51   : > { %589 = vmatpush.bf16.msra.mxu0 %v1133_v18 }
  0x52   : > { %602 = vmatpush.bf16.msra.mxu1 %v1141_v19  ;;  %v424_v29 = vadd.f32 %v1268_v17, %v423_v26 }
  0x54   : > { %v426_v32 = vsel %vm425_vm0, %v1268_v17, %v424_v29 }
  0x55   : > { %590 = vmatpush.bf16.msra.mxu0 %v1132_v21 }
  0x56   : > { %603 = vmatpush.bf16.msra.mxu1 %v1140_v22 }
  0x59   : > { %591 = vmatpush.bf16.msra.mxu0 %v1131_v24 }
  0x5a   : > { %604 = vmatpush.bf16.msra.mxu1 %v1139_v25 }
  0x5d   : > { %592 = vmatpush.bf16.msra.mxu0 %v1130_v27 }
  0x5e   : > { %605 = vmatpush.bf16.msra.mxu1 %v1138_v28 }
  0x61   : > { %593 = vmatpush.bf16.msra.mxu0 %v1129_v30 }
  0x62   : > { %606 = vmatpush.bf16.msra.mxu1 %v1137_v31 }
  0xbe   : > { %v419_v33 = vpop.xlane.xlu0 %418 }
  0xbf   : > { %v427_v34 = vmul.f32 %v426_v32, %v419_v33 }
  0xc1   : > { %v428_v35 = vadd.f32 1e-05, %v427_v34 }
  0xc3   : > { %1269 = vrsqrt.f32 %v428_v35  ;;  %vm435_vm2 = vweird.f32 %v428_v35 }
  0xc9   : > { %v1270_v36 = vpop.eup %1269 }
  0xca   : > { %v430_v37 = vmul.f32 %v1270_v36, %v428_v35  ;;  %vm436_vm1 = vweird.f32 %v1270_v36 }
  0xcb   : > { %vm437_vm3 = vmor %vm435_vm2, %vm436_vm1 }
  0xcc   : > { %v431_v38 = vmul.f32 %v1270_v36, %v430_v37 }
  0xce   : > { %v432_v39 = vmul.f32 0.5, %v431_v38 }
  0xd0   : > { %v433_v40 = vsub.f32 1.5, %v432_v39 }
  0xd2   : > { %v434_v42 = vmul.f32 %v1270_v36, %v433_v40 }
  0xd4   : > { %v438_v45 = vsel %vm437_vm3, %v1270_v36, %v434_v42 }
  0xd5   : > { %v439_v46 = vmul.f32 %v438_v45, %v1603_v5  ;;  %v440_v47 = vmul.f32 %v438_v45, %v1605_v6 }
  0xd7   : > { %v447_v48 = vmul.f32 %v443_v43, %v439_v46  ;;  %v448_v49 = vmul.f32 %v444_v44, %v440_v47 }
  0xd9   : > { %v449_v50 = vpack.c.bf16 %v448_v49, %v447_v48 }
  0xdb   : > { %450 = vst [vmem:[#allocation2] sm:$0xff] %v449_v50  ;;  %v484_v51 = vunpack.c.l.b16 %v449_v50  ;;  %v485_v52 = vunpack.c.h.b16 %v449_v50 }
  0xdd   : > { %v486_v53 = vpack.c.b16 %v484_v51, %v484_v51  ;;  %v487_v54 = vpack.c.b16 %v485_v52, %v485_v52 }
  0xdf   : > { %594 = vmatmul.bf16.vlgmr.msra.gmra.mxu0 %v486_v53  ;;  %607 = vmatmul.bf16.vlgmr.msra.gmra.mxu1 %v487_v54 }
 0x15c   : > { %v595_v55 = vpop.f32.mrf.mxu0  ;;  %v608_v56 = vpop.f32.mrf.mxu1 }
 0x15d   : > { %v609_v57 = vadd.f32 %v608_v56, %v595_v55 }
 0x15f   : > { %v612_v58 = vpack.c.bf16 %v609_v57, %v609_v57 }
 0x161   : > { %614 = vst.msk [vmem:[#allocation3] sm:$0xf] %vm613_vm4, %v612_v58 }
 0x164   : > { %v597_v59 = vpop.f32.mrf.mxu0  ;;  %v610_v60 = vpop.f32.mrf.mxu1 }
 0x165 PF: > { %v1152_v61 = vld [vmem:[%s1583_s9 + $0x38] sm:$0xff]  ;;  %v1151_v63 = vld [vmem:[%s1583_s9 + $0x30] sm:$0xff]  ;;  %v1150_v3 = vld [vmem:[%s1583_s9 + $0x28] sm:$0xff]  ;;  %vm665_vm5 = vcmask 261120   ;;  %p823_p8 = scmp.lt.s32.totalorder %s1405_s30, 4  ;;  %v811_v29 = vlaneseq  ;;  %p826_p9 = scmp.lt.s32.totalorder %s1405_s30, 2 }
 0x166   : > { %v1160_v62 = vld [vmem:[%s1583_s9 + $0x78] sm:$0xff]  ;;  %785 = vmatpush.bf16.msra.mxu1 %v1152_v61  ;;  %v1159_v0 = vld [vmem:[%s1583_s9 + $0x70] sm:$0xff]  ;;  %v1158_v4 = vld [vmem:[%s1583_s9 + $0x68] sm:$0xff]  ;;  %s1163_s17 = smul.u32 6, %s1409_s8  ;;  %v1428_v31 = vmov 1.0   ;;  %s1319_s22 = scalar_lea.hbm %s1755_s7, 48 }
 0x167   : > { %798 = vmatpush.bf16.msra.mxu2 %v1160_v62  ;;  %v1162_v1 = vld [vmem:[%s1599_s21 + $0x8] sm:$0xff]  ;;  %v1161_v2 = vld [vmem:[%s1599_s21] sm:$0xff]  ;;  %s1427_s21 = smov 64   ;;  %v812_v30 = vand.u32 127, %v811_v29 }
 0x168   : > { %675 = vmatpush.bf16.msra.mxu0 %v1162_v1  ;;  %v648_v5 = vld [vmem:[#allocation3] sm:$0xf]  ;;  %v1149_v6 = vld [vmem:[%s1583_s9 + $0x20] sm:$0xff]  ;;  %v1147_v10 = vld [vmem:[%s1583_s9 + $0x10] sm:$0xff]  ;;  %s827_s19 = scalar_select %p826_p9, 1, 0 }
 0x169   : > { %v1157_v7 = vld [vmem:[%s1583_s9 + $0x60] sm:$0xff]  ;;  %v1148_v8 = vld [vmem:[%s1583_s9 + $0x18] sm:$0xff]  ;;  %v1155_v11 = vld [vmem:[%s1583_s9 + $0x50] sm:$0xff]  ;;  %vm813_vm6 = vcmp.lt.s32.totalorder %v812_v30, 64  ;;  %s852_s26 = sadd.s32 %s1405_s30, %s1163_s17  ;;  %s856_s30 = sshll.u32 %s401_s20, 4  ;;  %s857_s30 = int_to_ptr.vmem [resolvable:$true] %s856_s30 }
 0x16a   : > { %786 = vmatpush.bf16.msra.mxu1 %v1151_v63  ;;  %v1156_v9 = vld [vmem:[%s1583_s9 + $0x58] sm:$0xff]  ;;  %v1146_v12 = vld [vmem:[%s1583_s9 + $0x8] sm:$0xff]  ;;  %v1145_v17 = vld [vmem:[%s1583_s9] sm:$0xff]  ;;  %s828_s16 = scvt.s32.f32 %s827_s19  ;;  %v814_v32 = vsel %vm813_vm6, -1.0, %v1428_v31  ;;  %s1125_s29 = sshll.u32 %s852_s26, 2 }
 0x16b   : > { %799 = vmatpush.bf16.msra.mxu2 %v1159_v0  ;;  %v1154_v13 = vld [vmem:[%s1583_s9 + $0x48] sm:$0xff]  ;;  %v615_v14 = vld [vmem:[#allocation2] sm:$0xff]  ;;  %v1153_v18 = vld [vmem:[%s1583_s9 + $0x40] sm:$0xff]  ;;  %s824_s9 = scalar_select %p823_p8, 1, 0 }
 0x16c   : > { %676 = vmatpush.bf16.msra.mxu0 %v1161_v2  ;;  %v683_v15 = vunpack.c.l.b16 %v615_v14  ;;  %v684_v16 = vunpack.c.h.b16 %v615_v14  ;;  %v818_v33 = vld [vmem:[%s1753_s5] sm:$0xff]  ;;  %s829_s24 = smul.f32 -0.9116117, %s828_s16  ;;  %s854_s19 = scalar_lea.hbm %s1755_s7, %s1125_s29 }
 0x16d   : > { %s825_s27 = scvt.s32.f32 %s824_s9  ;;  %v820_v35 = vld [vmem:[%s1754_s6] sm:$0xff]  ;;  %s858_s16 = sshll.u32 %s854_s19, 4  ;;  %s859_s16 = int_to_ptr.hbm [resolvable:$true] %s858_s16 }
 0x16e   : > { %787 = vmatpush.bf16.msra.mxu1 %v1150_v3  ;;  %v685_v19 = vpack.c.b16 %v683_v15, %v683_v15  ;;  %v686_v20 = vpack.c.b16 %v684_v16, %v684_v16  ;;  %s830_s8 = sadd.f32 1.0, %s829_s24  ;;  %s1313_s17 = sshra.s32 %s859_s16, 4  ;;  %s1314_s17 = int_to_ptr.hbm [resolvable:$true] %s1313_s17 }
 0x16f   : > { %800 = vmatpush.bf16.msra.mxu2 %v1158_v4  ;;  %1059 = vmatmul.msk.bf16.vlgmr.msra.gmra.mxu0 %vm665_vm5, %v648_v5  ;;  %s833_s13 = ssub.f32 1.0, %s825_s27  ;;  %v831_v40 = vstv %s825_s27  ;;  %s842_s27 = scalar_lea.sflag [#allocation6], %s399_s14 }
 0x170   : > { %v837_v44 = vstv %s830_s8  ;;  %s1315_s12 = scalar_lea.hbm %s1314_s17, 4  ;;  %p1320_p0 = scmp.lt.s32.totalorder %s1314_s17, %s1755_s7 }
 0x171   : > { %v834_v39 = vstv %s833_s13  ;;  %p1316_p10 = scmp.ne.s32.totalorder %s1314_s17, %s1315_s12  ;;  %p1321_p2 = scmp.lt.s32.totalorder %s1319_s22, %s1315_s12 }
 0x172   : > { %788 = vmatpush.bf16.msra.mxu1 %v1149_v6 }
 0x173   : > { %801 = vmatpush.bf16.msra.mxu2 %v1157_v7  ;;  %p1317_p11 = pnand %p1316_p10, %p1559_p13  ;;  %p1322_p4 = por %p1321_p2, %p1320_p0 }
 0x175   : > { %p1318_p12 = pneg %p1317_p11 }
 0x176   : > { %789 = vmatpush.bf16.msra.mxu1 %v1148_v8 }
 0x177   : > { %802 = vmatpush.bf16.msra.mxu2 %v1156_v9  ;;  %p1323_p3 = pnand %p1322_p4, %p1318_p12 }
 0x17a   : > { %790 = vmatpush.bf16.msra.mxu1 %v1147_v10 }
 0x17b   : > { %803 = vmatpush.bf16.msra.mxu2 %v1155_v11 }
 0x17e   : > { %791 = vmatpush.bf16.msra.mxu1 %v1146_v12 }
 0x17f   : > { %804 = vmatpush.bf16.msra.mxu2 %v1154_v13 }
 0x182   : > { %792 = vmatpush.bf16.msra.mxu1 %v1145_v17 }
 0x183   : > { %805 = vmatpush.bf16.msra.mxu2 %v1153_v18 }
 0x185   : > { %793 = vmatmul.bf16.vlgmr.msra.gmra.mxu1 %v685_v19 }
 0x186   : > { %806 = vmatmul.bf16.vlgmr.msra.gmra.mxu2 %v686_v20 }
 0x1ec   : > { %v678_v21 = vpop.f32.mrf.mxu0 }
 0x1f4   : > { %v680_v22 = vpop.f32.mrf.mxu0 }
 0x202   : > { %v794_v23 = vpop.f32.mrf.mxu1 }
 0x203   : > { %v795_v24 = vadd.f32 %v794_v23, %v678_v21 }
 0x209   : > { %v807_v25 = vpop.f32.mrf.mxu2 }
 0x20a   : > { %v808_v26 = vadd.f32 %v807_v25, %v795_v24  ;;  %v796_v27 = vpop.f32.mrf.mxu1 }
 0x20c   : > { %815 = vrot.lane.b32.xlu0 %v808_v26, %s1427_s21  ;;  %v819_v37 = vmul.f32 %v818_v33, %v808_v26  ;;  %v835_v42 = vmul.f32 %v834_v39, %v808_v26 }
 0x211   : > { %v809_v28 = vpop.f32.mrf.mxu2 }
 0x27e   : > { %v816_v34 = vpop.permute.xlu0 %815 }
 0x27f   : > { %v817_v36 = vmul.f32 %v816_v34, %v814_v32 }
 0x281   : > { %v821_v38 = vmul.f32 %v820_v35, %v817_v36 }
 0x283   : > { %v822_v41 = vadd.f32 %v821_v38, %v819_v37 }
 0x285   : > { %v832_v43 = vmul.f32 %v831_v40, %v822_v41 }
 0x287   : > { %v836_v45 = vadd.f32 %v835_v42, %v832_v43 }
 0x289   : > { %v838_v46 = vmul.f32 %v837_v44, %v836_v45 }
 0x28b   : > { %v839_v47 = vpack.c.bf16 %v838_v46, %v838_v46 }
 0x28d   : > { %840 = vst [vmem:[%s401_s20] sm:$0xf] %v839_v47 }
 0x28e   : > { %1326 = shalt.err (!%p1323_p3)
}
 0x28f   : > { %1166 = dma.vmem_to_hbm [thread:$0]  (%p1559_p13), %s857_s30, 64, %s859_s16, %s842_s27  }
 0x290 PF: > { %s1782_s14 = sld [smem:[#allocation11_spill]]  ;;  %p1172_p5 = scmp.ge.s32.totalorder %s1421_s11, 2 }
 0x292   : > { %p1169_p6 = pnand %p1172_p5, %p1563_p1 }
 0x294   : > { %p1170_p7 = pneg %p1169_p6 }
 0x296   : > { %s870_s20 = sand.u32 1, %s1782_s14  }
 0x297   : > { %s871_s26 = scalar_lea.sflag [#allocation6], %s870_s20 }
 0x298   : > { %1376 = dma.done.wait (%p1170_p7), %s871_s26, 64  }
 0x299   : > { %1378 = vsyncadd (%p1170_p7), %s871_s26, 4294967232  ;;  %s23_s11 = sadd.s32 1, %s1421_s11   ;;  %s1784_s8 = sld [smem:[#allocation12_spill]] }
 0x29a   : > { %p20_p8 = scmp.ge.s32.totalorder %s23_s11, 14   ;;  %s1785_s26 = sld [smem:[#allocation19_spill]] }
 0x29b   : > { %s1786_s29 = sld [smem:[#allocation13_spill]]  ;;  %s1792_s24 = smov %s1385_s25 }
 0x29c   : > { %s1787_s10 = sld [smem:[#allocation18_spill]]  ;;  %s1794_s27 = smov %s1397_s28 }
 0x29d   : > { %s1788_s30 = sld [smem:[#allocation14_spill]] }
 0x29e   : > { %s1789_s21 = sld [smem:[#allocation15_spill]] }
 0x29f   : > { %s1790_s9 = sld [smem:[#allocation16_spill]]  ;;  %s1793_s25 = smov %s1784_s8 }
 0x2a0   : > { %s1791_s19 = sld [smem:[#allocation17_spill]] }
 0x2a1   : > { %s1795_s28 = smov %s1786_s29 }
 0x2a2   : > { %s1796_s29 = smov %s1787_s10  ;;  %22 = sbr.rel (!%p20_p8) target bundleno = 9 (0x9), region = 149 }
 0x2a4   : > { %s1797_s8 = smov %s1789_s21 }
 0x2a6   : > { %s1798_s10 = smov %s1791_s19 }
 0x2a7   :  { %877 = vsyncpa [#allocation5], 1 }
 0x2a8   :  { %879 = vsyncpa [#allocation5 + $0x1], 1 }
 0x2a9   :  { %880 = vsyncpa [#allocation6], 1 }
 0x2aa   :  { %882 = vsyncpa [#allocation6 + $0x1], 1 }

</bundles_post_ra>
